<compile_context>
chip_gen: v5e
topology: v5e:2x2
jax: 0.10.0
libtpu: 0.0.40
codegen_flags: <defaults>
</compile_context>

<pallas_src>
import functools
import math

import jax
import jax.numpy as jnp
from jax.experimental import pallas as pl
from jax.experimental.pallas import tpu as pltpu


EPS = 1e-10


def _round_up(x, m):
    return ((x + m - 1) // m) * m


def _nalu_kernel(x_ref, gt_ref, wt_ref, out_ref, *, eps):
    """One batch tile of the NALU forward.

    x_ref  : (TB, in_dim)       f32  batch tile of the input
    gt_ref : (in_dim, out_dim)  f32  G^T  (VMEM-resident across grid steps)
    wt_ref : (in_dim, out_dim)  f32  W^T = (tanh(W_hat) * sigmoid(M_hat))^T
    out_ref: (TB, out_dim)      f32  output tile (un-padded)

    NOTE: when B % TB != 0 the tail block runs log/exp on out-of-bounds rows;
    those stores are dropped and every output row depends only on its own input
    row, so garbage rows cannot contaminate valid results — no mask needed.
    """
    x = x_ref[...]
    gt = gt_ref[...]
    wt = wt_ref[...]

    # Gate: sigmoid(z) == 0.5 * tanh(0.5 * z) + 0.5  (1 EUP op vs exp + divide).
    zg = jnp.dot(x, gt, preferred_element_type=jnp.float32)
    g = 0.5 * jnp.tanh(0.5 * zg) + 0.5

    # Additive path: a = x @ W^T.
    a = jnp.dot(x, wt, preferred_element_type=jnp.float32)

    # Multiplicative path: m = exp(log(|x| + eps) @ W^T).
    x_log = jnp.log(jnp.abs(x) + eps)
    m = jnp.exp(jnp.dot(x_log, wt, preferred_element_type=jnp.float32))

    # out = g*a + (1-g)*m  ==  m + g*(a - m)   (one fewer VPU op per element).
    out_ref[...] = m + g * (a - m)


def nalu_fuse_weights(G, W_hat, M_hat):
    """NAC weight fusion + transposes, hoisted out of the per-call forward.

    Cache the result when the weights are static (inference) — it is a full
    HBM read+write of all three weight matrices otherwise repeated per call.
    """
    W = jnp.tanh(W_hat) * jax.nn.sigmoid(M_hat)          # (out_dim, in_dim)
    return jnp.asarray(G).T, W.T                          # (in_dim, out_dim) x2


def _vmem_limit_bytes(tb, in_dim, out_dim):
    """Generation-aware VMEM limit: ~half of physical VMEM, floored at 16 MiB."""
    try:
        cap = int(getattr(pltpu.get_tpu_info(), "vmem_capacity_bytes", 64 << 20))
    except Exception:  # query unavailable: conservative (v7x-safe) default
        cap = 64 << 20
    # double-buffered x/out tiles + 2x-buffered resident weights + temporaries
    needed = 4 * (2 * tb * in_dim + 2 * tb * out_dim
                  + 4 * in_dim * out_dim + 4 * tb * out_dim + tb * in_dim)
    return int(min(max(2 * needed, 16 << 20), cap // 2))


def nalu_forward_fused(x, Gt, Wt, eps=EPS, block_b=2048):
    """x: (B, in_dim); Gt, Wt: (in_dim, out_dim) fused weights -> (B, out_dim)."""
    B, in_dim = x.shape
    out_dim = Gt.shape[1]

    # Batch tile: as large as possible (amortizes ~0.35 us per-step overhead),
    # capped by a VMEM row budget and capped so the grid has >= 2 steps when
    # B allows it (otherwise v7x's second TensorCore idles).
    row_bytes = 16 * (in_dim + out_dim)                  # tiles + temps, 2x buf
    max_tb_vmem = max(8, ((16 << 20) // row_bytes) // 8 * 8)
    tb = min(block_b, _round_up(B, 8), max_tb_vmem)
    if B > 8:
        tb = min(tb, _round_up((B + 1) // 2, 8))         # >= 2 grid steps
    grid = (pl.cdiv(B, tb),)

    cost = pl.CostEstimate(
        flops=6 * B * in_dim * out_dim,                  # 3 matmuls
        transcendentals=B * (in_dim + 2 * out_dim),      # log, exp, tanh
        bytes_accessed=4 * (B * in_dim + B * out_dim + 2 * in_dim * out_dim),
    )

    kernel = functools.partial(_nalu_kernel, eps=eps)
    return pl.pallas_call(
        kernel,
        out_shape=jax.ShapeDtypeStruct((B, out_dim), jnp.float32),
        grid=grid,
        in_specs=[
            pl.BlockSpec((tb, in_dim), lambda i: (i, 0)),        # batch-tiled x
            pl.BlockSpec((in_dim, out_dim), lambda i: (0, 0)),   # resident G^T
            pl.BlockSpec((in_dim, out_dim), lambda i: (0, 0)),   # resident W^T
        ],
        out_specs=pl.BlockSpec((tb, out_dim), lambda i: (i, 0)),
        compiler_params=pltpu.CompilerParams(
            dimension_semantics=("parallel",),
            vmem_limit_bytes=_vmem_limit_bytes(tb, in_dim, out_dim),
        ),
        cost_estimate=cost,
    )(x, Gt, Wt)


def nalu_forward(x, G, W_hat, M_hat, eps=EPS, block_b=2048):
    """x: (B, in_dim); G, W_hat, M_hat: (out_dim, in_dim)  ->  (B, out_dim)."""
    Gt, Wt = nalu_fuse_weights(G, W_hat, M_hat)
    return nalu_forward_fused(x, Gt, Wt, eps=eps, block_b=block_b)


def kaiming_uniform(key, shape, a=0.0):
    """Deterministic stand-in for torch.nn.init.kaiming_uniform_ (fan_in mode)."""
    fan_in = shape[1]
    gain = math.sqrt(2.0 / (1.0 + a * a))
    bound = gain * math.sqrt(3.0 / fan_in)
    return jax.random.uniform(key, shape, jnp.float32, minval=-bound, maxval=bound)


def nalu_reference(x, G, W_hat, M_hat, eps=EPS):
    """Pure-JAX reference mirroring the PyTorch forward."""
    W = jnp.tanh(W_hat) * jax.nn.sigmoid(M_hat)
    g = jax.nn.sigmoid(x @ G.T)
    a = x @ W.T
    m = jnp.exp(jnp.log(jnp.abs(x) + eps) @ W.T)
    return g * a + (1.0 - g) * m


if __name__ == "__main__":
    in_dim, out_dim, batch = 32, 16, 8

    key = jax.random.PRNGKey(0)
    k_x, k_g, k_w, k_m = jax.random.split(key, 4)

    # Parameters (deterministic, shapes match the PyTorch __init__).
    G = kaiming_uniform(k_g, (out_dim, in_dim), a=math.sqrt(5.0))
    W_hat = kaiming_uniform(k_w, (out_dim, in_dim), a=0.0)
    M_hat = kaiming_uniform(k_m, (out_dim, in_dim), a=0.0)

    x = jax.random.normal(k_x, (batch, in_dim), jnp.float32)

    out = nalu_forward(x, G, W_hat, M_hat)
    out = jax.block_until_ready(out)

    ref = nalu_reference(x, G, W_hat, M_hat)
    assert out.shape == (batch, out_dim)
    assert jnp.allclose(out, ref, atol=1e-5, rtol=1e-5), "mismatch vs reference"

    print("KERNEL_OK")
</pallas_src>

<mosaic_0001>
module attributes {stable_mosaic.version = 11 : i64} {
  func.func @_nalu_kernel(%arg0: i32, %arg1: memref<8x32xf32, #tpu.memory_space<vmem>>, %arg2: memref<32x16xf32, #tpu.memory_space<vmem>>, %arg3: memref<32x16xf32, #tpu.memory_space<vmem>>, %arg4: memref<8x16xf32, #tpu.memory_space<vmem>>) attributes {dimension_semantics = [#tpu.dimension_semantics<parallel>], iteration_bounds = array<i64: 1>, scalar_prefetch = 0 : i64, scratch_operands = 0 : i64, tpu.core_type = #tpu.core_type<tc>, window_params = [{transform_indices = @transform_0, window_bounds = array<i64: 8, 32>}, {pipeline_mode = #tpu.pipeline_mode<synchronous>, transform_indices = @transform_1, window_bounds = array<i64: 32, 16>}, {pipeline_mode = #tpu.pipeline_mode<synchronous>, transform_indices = @transform_2, window_bounds = array<i64: 32, 16>}, {transform_indices = @transform_3, window_bounds = array<i64: 8, 16>}]} {
    %c0 = arith.constant 0 : index
    %c0_0 = arith.constant 0 : index
    %0 = vector.load %arg1[%c0, %c0_0] : memref<8x32xf32, #tpu.memory_space<vmem>>, vector<8x32xf32>
    %c0_1 = arith.constant 0 : index
    %c0_2 = arith.constant 0 : index
    %1 = vector.load %arg2[%c0_1, %c0_2] : memref<32x16xf32, #tpu.memory_space<vmem>>, vector<32x16xf32>
    %c0_3 = arith.constant 0 : index
    %c0_4 = arith.constant 0 : index
    %2 = vector.load %arg3[%c0_3, %c0_4] : memref<32x16xf32, #tpu.memory_space<vmem>>, vector<32x16xf32>
    %cst = arith.constant dense<0.000000e+00> : vector<8x16xf32>
    %3 = tpu.matmul %0, %1, %cst {dimension_numbers = #tpu.dot_dimension_numbers<[1], [0], [0], [1], [0, 0, 1, 1], [], []>} : vector<8x32xf32>, vector<32x16xf32>, vector<8x16xf32> -> vector<8x16xf32>
    %cst_5 = arith.constant 5.000000e-01 : f32
    %4 = vector.broadcast %cst_5 : f32 to vector<8x16xf32>
    %5 = arith.mulf %4, %3 : vector<8x16xf32>
    %6 = math.tanh %5 : vector<8x16xf32>
    %cst_6 = arith.constant 5.000000e-01 : f32
    %7 = vector.broadcast %cst_6 : f32 to vector<8x16xf32>
    %8 = arith.mulf %7, %6 : vector<8x16xf32>
    %cst_7 = arith.constant 5.000000e-01 : f32
    %9 = vector.broadcast %cst_7 : f32 to vector<8x16xf32>
    %10 = arith.addf %8, %9 : vector<8x16xf32>
    %cst_8 = arith.constant dense<0.000000e+00> : vector<8x16xf32>
    %11 = tpu.matmul %0, %2, %cst_8 {dimension_numbers = #tpu.dot_dimension_numbers<[1], [0], [0], [1], [0, 0, 1, 1], [], []>} : vector<8x32xf32>, vector<32x16xf32>, vector<8x16xf32> -> vector<8x16xf32>
    %12 = math.absf %0 : vector<8x32xf32>
    %cst_9 = arith.constant 1.000000e-10 : f32
    %13 = vector.broadcast %cst_9 : f32 to vector<8x32xf32>
    %14 = arith.addf %12, %13 : vector<8x32xf32>
    %15 = math.log %14 : vector<8x32xf32>
    %cst_10 = arith.constant dense<0.000000e+00> : vector<8x16xf32>
    %16 = tpu.matmul %15, %2, %cst_10 {dimension_numbers = #tpu.dot_dimension_numbers<[1], [0], [0], [1], [0, 0, 1, 1], [], []>} : vector<8x32xf32>, vector<32x16xf32>, vector<8x16xf32> -> vector<8x16xf32>
    %17 = math.exp %16 : vector<8x16xf32>
    %18 = arith.subf %11, %17 : vector<8x16xf32>
    %19 = arith.mulf %10, %18 : vector<8x16xf32>
    %20 = arith.addf %17, %19 : vector<8x16xf32>
    %c0_11 = arith.constant 0 : index
    %c0_12 = arith.constant 0 : index
    %21 = vector.load %arg4[%c0_11, %c0_12] : memref<8x16xf32, #tpu.memory_space<vmem>>, vector<8x16xf32>
    tpu.vector_store %arg4[%c0_11, %c0_12], %20 {strides = array<i32>} : memref<8x16xf32, #tpu.memory_space<vmem>>, vector<8x16xf32>,
    return
  }
  func.func @transform_0(%arg0: i32) -> (i32, i32) {
    %c0_i32 = arith.constant 0 : i32
    %c0_i32_0 = arith.constant 0 : i32
    return %arg0, %c0_i32 : i32, i32
  }
  func.func @transform_1(%arg0: i32) -> (i32, i32) {
    %c0_i32 = arith.constant 0 : i32
    %c0_i32_0 = arith.constant 0 : i32
    %c0_i32_1 = arith.constant 0 : i32
    return %c0_i32, %c0_i32_0 : i32, i32
  }
  func.func @transform_2(%arg0: i32) -> (i32, i32) {
    %c0_i32 = arith.constant 0 : i32
    %c0_i32_0 = arith.constant 0 : i32
    %c0_i32_1 = arith.constant 0 : i32
    return %c0_i32, %c0_i32_0 : i32, i32
  }
  func.func @transform_3(%arg0: i32) -> (i32, i32) {
    %c0_i32 = arith.constant 0 : i32
    %c0_i32_0 = arith.constant 0 : i32
    return %arg0, %c0_i32 : i32, i32
  }
}

</mosaic_0001>

<bundles_post_ra>
// kernel: tpu_custom_call.1
= control target key start
LH: loop header
LB: loop body
LE: loop exit
PB: predicated region body
PF: predicated region fallthrough
CT: control target
= control target key end

     0   :  { %s209_s0 = inlined_call_operand.vmem [shape: f32[8,32], index: 0, kind: input, shape index: {}]   ;;  %s210_s1 = inlined_call_operand.vmem [shape: f32[32,16], index: 1, kind: input, shape index: {}]   ;;  %s211_s2 = inlined_call_operand.vmem [shape: f32[32,16], index: 2, kind: input, shape index: {}]   ;;  %s212_s3 = inlined_call_operand.hbm [shape: f32[8,16], index: 3, kind: output, shape index: {}]  }
   0x1   :  { %v23_v0 = vld [vmem:[%s211_s2 + $0x18] sm:$0xff]  ;;  %v22_v1 = vld [vmem:[%s211_s2 + $0x10] sm:$0xff]  ;;  %v21_v4 = vld [vmem:[%s211_s2 + $0x8] sm:$0xff] }
   0x2   :  { %v19_v2 = vld [vmem:[%s210_s1 + $0x18] sm:$0xff]  ;;  %91 = vmatpush.msra.mxu2 %v23_v0  ;;  %v18_v3 = vld [vmem:[%s210_s1 + $0x10] sm:$0xff]  ;;  %v15_v5 = vld [vmem:[%s209_s0] sm:$0xff]  ;;  %64 = vmatpush.msra.mxu1 %v23_v0 }
   0x3   :  { %40 = vmatpush.msra.mxu0 %v19_v2  ;;  %v17_v6 = vld [vmem:[%s210_s1 + $0x8] sm:$0xff]  ;;  %v72_v7 = vand.u32 2147483647, %v15_v5 }
   0x4   :  { %92 = vmatpush.msra.mxu2 %v22_v1 }
   0x5   :  { %41 = vmatpush.msra.mxu0 %v18_v3 }
   0x6   :  { %8 = vsyncpa [#allocation3], 0  ;;  %v20_v8 = vld [vmem:[%s211_s2] sm:$0xff]  ;;  %65 = vmatpush.msra.mxu1 %v22_v1  ;;  %93 = vmatpush.msra.mxu2 %v21_v4  ;;  %v73_v10 = vadd.f32 1e-10, %v72_v7  ;;  %vm24_vm0 = vcmask 261120  }
   0x7   :  { %v16_v9 = vld [vmem:[%s210_s1] sm:$0xff]  ;;  %42 = vmatpush.msra.mxu0 %v17_v6  ;;  %s158_s0 = smov [#allocation2]   ;;  %s113_s4 = sshll.u32 %s212_s3, 4  ;;  %vm104_vm1 = vcmask 130048   ;;  %s114_s4 = int_to_ptr.hbm [resolvable:$true] %s113_s4 }
   0x8   :  { %66 = vmatpush.msra.mxu1 %v21_v4  ;;  %94 = vmatpush.msra.mxu2 %v20_v8  ;;  %126 = vlog2.f32 %v73_v10  ;;  %s111_s1 = sshll.u32 %s158_s0, 4  ;;  %s112_s1 = int_to_ptr.vmem [resolvable:$true] %s111_s1 }
   0x9   :  { %43 = vmatpush.msra.mxu0 %v16_v9 }
   0xa   :  { %122 = vmatmul.msk.f32.vlgmr.msra.gmra.mxu0 %vm24_vm0, %v15_v5  ;;  %67 = vmatpush.msra.mxu1 %v20_v8 }
   0xb   :  { %123 = vmatmul.msk.f32.vlgmr.msra.gmra.mxu1 %vm24_vm0, %v15_v5 }
   0xe   :  { %v127_v11 = vpop.eup %126 }
   0xf   :  { %v75_v12 = vmul.f32 0.6931472, %v127_v11 }
  0x11   :  { %124 = vmatmul.msk.f32.vlgmr.msra.gmra.mxu2 %vm24_vm0, %v75_v12 }
  0x87   :  { %v45_v13 = vpop.f32.mrf.mxu0 }
  0x88   :  { %v48_v14 = vmul.f32 0.5, %v45_v13  ;;  %v69_v19 = vpop.f32.mrf.mxu1 }
  0x8a   :  { %128 = vtanh.f32 %v48_v14 }
  0x90   :  { %v129_v16 = vpop.eup %128 }
  0x91   :  { %v50_v18 = vmul.f32 0.5, %v129_v16 }
  0x93   :  { %v51_v20 = vadd.f32 0.5, %v50_v18 }
  0x94   :  { %v96_v15 = vpop.f32.mrf.mxu2 }
  0x95   :  { %v99_v17 = vmul.f32 1.442695, %v96_v15 }
  0x97   :  { %130 = vpow2.f32 %v99_v17 }
  0x9d   :  { %v131_v21 = vpop.eup %130 }
  0x9e   :  { %v101_v22 = vsub.f32 %v69_v19, %v131_v21 }
  0xa0   :  { %v102_v23 = vmul.f32 %v101_v22, %v51_v20 }
  0xa2   :  { %v103_v24 = vadd.f32 %v131_v21, %v102_v23 }
  0xa4   :  { %105 = vst.msk [vmem:[#allocation2] sm:$0xff] %vm104_vm1, %v103_v24 }
  0xa5   :  { %116 = dma.vmem_to_hbm [thread:$0]  %s112_s1, 128, %s114_s4, [#allocation3]  }
  0xa6   :  { %156 = dma.done.wait [#allocation3], 128  }
  0xa7   :  { %157 = vsyncadd [#allocation3], 4294967168 }
  0xa8   :  { %121 = vsyncpa [#allocation3], 1 }

</bundles_post_ra>
